<compile_context>
chip_gen: v6e
topology: v6e:2x2x1
jax: 0.10.0
libtpu: 0.0.40
codegen_flags: <defaults>
</compile_context>

<pallas_src>
import functools

import jax
import jax.numpy as jnp
from jax import lax
from jax.experimental import pallas as pl
from jax.experimental.pallas import tpu as pltpu


# --------------------------------------------------------------------------
# Fused kernel: ReLU -> (in-kernel height zero pad) -> conv as K row-matmuls
# -> + folded BN bias.  One grid step handles (batch element b, row tile t).
# --------------------------------------------------------------------------
def _stdconv_kernel(x_ref, w_ref, bias_ref, o_ref, xpad_ref, *,
                    k, stride, pad, th):
    # x_ref:    (1, H, W*Cin)         input rows for this batch element
    # w_ref:    (K, W*Cin, Wo*Cout)   per-kh row-conv weights (BN scale + width
    #                                 padding folded in on the host)
    # bias_ref: (1, Wo*Cout)          folded BN bias, tiled over Wo (f32)
    # o_ref:    (1, TH, Wo*Cout)      lane-dense output tile
    # xpad_ref: (Hp, W*Cin)           VMEM scratch: height-padded, ReLU'd input
    h = x_ref.shape[1]
    wocout = o_ref.shape[2]
    t = pl.program_id(1)

    # Fill the ReLU'd, height-padded scratch slab once per batch element.
    # (t is the innermost "arbitrary" grid axis, so t==0 runs first for each b
    # and the scratch persists across the remaining row tiles of that b.)
    @pl.when(t == 0)
    def _():
        xpad_ref[...] = jnp.zeros_like(xpad_ref)
        xpad_ref[pad:pad + h, :] = jnp.maximum(x_ref[0], 0).astype(
            xpad_ref.dtype)

    row0 = pl.multiple_of(t * (th * stride), th * stride)

    # f32 accumulator, initialized with the folded BN bias.
    acc = jnp.broadcast_to(bias_ref[...].astype(jnp.float32), (th, wocout))
    for kh in range(k):                                   # static K-tap loop
        if stride == 1:
            rows = xpad_ref[pl.ds(row0 + kh, th), :]      # (TH, W*Cin)
        else:
            rows = xpad_ref[pl.ds(row0 + kh, th, stride), :]
        acc = acc + jnp.dot(rows, w_ref[kh],              # MXU, f32 accum
                            preferred_element_type=jnp.float32)

    o_ref[0] = acc.astype(o_ref.dtype)                    # unmasked 128-lane store


# --------------------------------------------------------------------------
# Host-side weight lowering: (K, K, Cin, Cout) conv weights (BN scale already
# folded into Cout) -> per-kh row matrices T_kh of shape (W*Cin, Wo*Cout):
#   T_kh[col*Cin+ci, w*Cout+c] = W[kh, col + pad - w*stride, ci, c]
# (0 when the kw tap index falls outside [0, K) -- this also absorbs the
#  width zero-padding, so the kernel never materializes padded columns.)
# --------------------------------------------------------------------------
def _build_row_weights(w_folded, *, w_in, wo, stride, pad):
    k, _, cin, cout = w_folded.shape
    col = jnp.arange(w_in)                                # unpadded input column
    wout = jnp.arange(wo)                                 # output column
    kw = (col[:, None] + pad) - wout[None, :] * stride    # (W, Wo)
    valid = ((kw >= 0) & (kw < k)).astype(w_folded.dtype)
    kw_c = jnp.clip(kw, 0, k - 1)
    t = w_folded[:, kw_c]                                 # (K, W, Wo, Cin, Cout)
    t = t * valid[None, :, :, None, None]
    t = jnp.transpose(t, (0, 1, 3, 2, 4))                 # (K, W, Cin, Wo, Cout)
    return t.reshape(k, w_in * cin, wo * cout)


def _stdconv_nhwc(x_nhwc, w_hwio, gamma, beta, mean, var, *, stride, padding,
                  eps=1e-5, compute_dtype=jnp.float32):
    n, h, w, cin = x_nhwc.shape
    k = w_hwio.shape[0]
    cout = w_hwio.shape[-1]
    hp, wp = h + 2 * padding, w + 2 * padding
    ho = (hp - k) // stride + 1
    wo = (wp - k) // stride + 1

    # Fold eval-mode BatchNorm into the conv weights + a per-channel bias.
    scale = gamma / jnp.sqrt(var + eps)
    bias = beta - mean * scale
    w_folded = (w_hwio * scale[None, None, None, :]).astype(compute_dtype)
    w_rows = _build_row_weights(w_folded, w_in=w, wo=wo, stride=stride,
                                pad=padding)
    bias_row = jnp.tile(bias, wo).reshape(1, wo * cout).astype(jnp.float32)

    # Lane-dense input view: (N, H, W*Cin) -- a free reshape of NHWC.
    x_rows = x_nhwc.reshape(n, h, w * cin)

    # Output-row tiling: one step per image when Ho is small (least per-step
    # overhead); 8/16/32-row tiles only when Ho is large enough to pipeline.
    if ho % 8 == 0 and ho > 64:
        th = 32 if ho % 32 == 0 else (16 if ho % 16 == 0 else 8)
    else:
        th = ho
    grid = (n, ho // th)

    kernel = functools.partial(_stdconv_kernel, k=k, stride=stride,
                               pad=padding, th=th)

    return pl.pallas_call(
        kernel,
        out_shape=jax.ShapeDtypeStruct((n, ho, wo * cout), jnp.float32),
        grid=grid,
        in_specs=[
            pl.BlockSpec((1, h, w * cin), lambda b, t: (b, 0, 0)),
            pl.BlockSpec((k, w * cin, wo * cout), lambda b, t: (0, 0, 0)),
            pl.BlockSpec((1, wo * cout), lambda b, t: (0, 0)),
        ],
        out_specs=pl.BlockSpec((1, th, wo * cout), lambda b, t: (b, t, 0)),
        scratch_shapes=[pltpu.VMEM((hp, w * cin), compute_dtype)],
        compiler_params=pltpu.CompilerParams(
            # b "parallel" -> megacore / 2-TC sharding; t "arbitrary" so the
            # per-b scratch fill at t == 0 is legal across the row tiles.
            dimension_semantics=("parallel", "arbitrary"),
            vmem_limit_bytes=32 * 1024 * 1024),
    )(x_rows, w_rows, bias_row)


# --------------------------------------------------------------------------
# Public wrapper: PyTorch-style NCHW in / NCHW out.
# --------------------------------------------------------------------------
@functools.partial(jax.jit, static_argnames=("stride", "padding", "compute_dtype"))
def std_conv(x_nchw, params, *, stride, padding, compute_dtype=jnp.float32):
    x_nhwc = jnp.transpose(x_nchw, (0, 2, 3, 1))
    y = _stdconv_nhwc(x_nhwc, params["w"], params["gamma"], params["beta"],
                      params["mean"], params["var"], stride=stride,
                      padding=padding, compute_dtype=compute_dtype)
    n, ho, wc = y.shape
    cout = params["w"].shape[-1]
    y = y.reshape(n, ho, wc // cout, cout)                # free reshape
    return jnp.transpose(y, (0, 3, 1, 2))                 # NHWC -> NCHW


# --------------------------------------------------------------------------
# Pure-JAX reference (lax.conv + explicit BN) for correctness checking
# --------------------------------------------------------------------------
def std_conv_ref(x_nchw, params, *, stride, padding, eps=1e-5):
    x = jnp.transpose(x_nchw, (0, 2, 3, 1))
    y = jnp.maximum(x, 0.0)
    y = lax.conv_general_dilated(
        y, params["w"], window_strides=(stride, stride),
        padding=[(padding, padding), (padding, padding)],
        dimension_numbers=("NHWC", "HWIO", "NHWC"))
    inv = params["gamma"] / jnp.sqrt(params["var"] + eps)
    y = (y - params["mean"]) * inv + params["beta"]
    return jnp.transpose(y, (0, 3, 1, 2))


def make_params(key, c_in, c_out, k):
    k1, k2, k3, k4, k5 = jax.random.split(key, 5)
    w = jax.random.normal(k1, (k, k, c_in, c_out), jnp.float32) * 0.2
    gamma = 1.0 + 0.1 * jax.random.normal(k2, (c_out,), jnp.float32)
    beta = 0.1 * jax.random.normal(k3, (c_out,), jnp.float32)
    mean = 0.1 * jax.random.normal(k4, (c_out,), jnp.float32)
    var = 1.0 + 0.1 * jax.random.uniform(k5, (c_out,), jnp.float32)
    return dict(w=w, gamma=gamma, beta=beta, mean=mean, var=var)


if __name__ == "__main__":
    key = jax.random.PRNGKey(0)
    kx, kp = jax.random.split(key)

    # StdConv(C_in=4, C_out=8, kernel_size=3, stride=1, padding=1)
    N, C_IN, C_OUT, H, W = 2, 4, 8, 16, 16
    K, STRIDE, PAD = 3, 1, 1

    x = jax.random.normal(kx, (N, C_IN, H, W), jnp.float32)
    params = make_params(kp, C_IN, C_OUT, K)

    ref = std_conv_ref(x, params, stride=STRIDE, padding=PAD)

    # f32 compute path (v5e-friendly; exact check vs. the f32 reference).
    out = std_conv(x, params, stride=STRIDE, padding=PAD)
    out = jax.block_until_ready(out)
    assert out.shape == (N, C_OUT, H, W), out.shape
    assert jnp.allclose(out, ref, atol=1e-4, rtol=1e-4), \
        float(jnp.abs(out - ref).max())

    # bf16 compute path (v6e/v7x MXU path); looser tolerance vs. f32 reference.
    out_bf16 = std_conv(x, params, stride=STRIDE, padding=PAD,
                        compute_dtype=jnp.bfloat16)
    out_bf16 = jax.block_until_ready(out_bf16)
    assert jnp.allclose(out_bf16, ref, atol=5e-2, rtol=5e-2), \
        float(jnp.abs(out_bf16 - ref).max())

    print("KERNEL_OK")
</pallas_src>

<mosaic_0001>
module attributes {stable_mosaic.version = 11 : i64} {
  func.func @_stdconv_kernel(%arg0: i32, %arg1: i32, %arg2: memref<1x16x64xf32, #tpu.memory_space<vmem>>, %arg3: memref<3x64x128xf32, #tpu.memory_space<vmem>>, %arg4: memref<1x128xf32, #tpu.memory_space<vmem>>, %arg5: memref<1x16x128xf32, #tpu.memory_space<vmem>>, %arg6: memref<18x64xf32, #tpu.memory_space<vmem>>) attributes {dimension_semantics = [#tpu.dimension_semantics<parallel>, #tpu.dimension_semantics<arbitrary>], iteration_bounds = array<i64: 2, 1>, scalar_prefetch = 0 : i64, scratch_operands = 1 : i64, tpu.core_type = #tpu.core_type<tc>, window_params = [{transform_indices = @transform_0, window_bounds = array<i64: 1, 16, 64>}, {pipeline_mode = #tpu.pipeline_mode<synchronous>, transform_indices = @transform_1, window_bounds = array<i64: 3, 64, 128>}, {pipeline_mode = #tpu.pipeline_mode<synchronous>, transform_indices = @transform_2, window_bounds = array<i64: 1, 128>}, {transform_indices = @transform_3, window_bounds = array<i64: 1, 16, 128>}]} {
    %c0_i32 = arith.constant 0 : i32
    %0 = arith.cmpi eq, %arg1, %c0_i32 : i32
    %1 = arith.extui %0 : i1 to i32
    %c0_i32_0 = arith.constant 0 : i32
    %2 = arith.cmpi ne, %1, %c0_i32_0 : i32
    scf.if %2 {
      %cst_18 = arith.constant 0.000000e+00 : f32
      %32 = vector.broadcast %cst_18 : f32 to vector<18x64xf32>
      %c0_19 = arith.constant 0 : index
      %c0_20 = arith.constant 0 : index
      %33 = vector.load %arg6[%c0_19, %c0_20] : memref<18x64xf32, #tpu.memory_space<vmem>>, vector<18x64xf32>
      tpu.vector_store %arg6[%c0_19, %c0_20], %32 {strides = array<i32>} : memref<18x64xf32, #tpu.memory_space<vmem>>, vector<18x64xf32>,
      %c0_21 = arith.constant 0 : index
      %c0_22 = arith.constant 0 : index
      %c0_23 = arith.constant 0 : index
      %34 = vector.load %arg2[%c0_21, %c0_22, %c0_23] : memref<1x16x64xf32, #tpu.memory_space<vmem>>, vector<1x16x64xf32>
      %35 = vector.shape_cast %34 : vector<1x16x64xf32> to vector<16x64xf32>
      %cst_24 = arith.constant 0.000000e+00 : f32
      %36 = vector.broadcast %cst_24 : f32 to vector<16x64xf32>
      %37 = arith.maximumf %35, %36 : vector<16x64xf32>
      %c1_25 = arith.constant 1 : index
      %c0_26 = arith.constant 0 : index
      %38 = vector.load %arg6[%c1_25, %c0_26] : memref<18x64xf32, #tpu.memory_space<vmem>>, vector<16x64xf32>
      tpu.vector_store %arg6[%c1_25, %c0_26], %37 {strides = array<i32>} : memref<18x64xf32, #tpu.memory_space<vmem>>, vector<16x64xf32>,
    } else {
    }
    %c16_i32 = arith.constant 16 : i32
    %3 = arith.muli %arg1, %c16_i32 : i32
    %4 = tpu.assume_multiple %3, 16 : i32
    %c0 = arith.constant 0 : index
    %c0_1 = arith.constant 0 : index
    %5 = vector.load %arg4[%c0, %c0_1] : memref<1x128xf32, #tpu.memory_space<vmem>>, vector<1x128xf32>
    %6 = vector.shape_cast %5 : vector<1x128xf32> to vector<1x128xf32>
    %7 = vector.broadcast %6 : vector<1x128xf32> to vector<16x128xf32>
    %c0_i32_2 = arith.constant 0 : i32
    %8 = arith.addi %4, %c0_i32_2 : i32
    %9 = arith.index_cast %8 : i32 to index
    %c0_3 = arith.constant 0 : index
    %10 = vector.load %arg6[%9, %c0_3] : memref<18x64xf32, #tpu.memory_space<vmem>>, vector<16x64xf32>
    %c0_4 = arith.constant 0 : index
    %c0_5 = arith.constant 0 : index
    %c0_6 = arith.constant 0 : index
    %11 = vector.load %arg3[%c0_4, %c0_5, %c0_6] : memref<3x64x128xf32, #tpu.memory_space<vmem>>, vector<1x64x128xf32>
    %12 = vector.shape_cast %11 : vector<1x64x128xf32> to vector<64x128xf32>
    %cst = arith.constant dense<0.000000e+00> : vector<16x128xf32>
    %13 = tpu.matmul %10, %12, %cst {dimension_numbers = #tpu.dot_dimension_numbers<[1], [0], [0], [1], [0, 0, 1, 1], [], []>} : vector<16x64xf32>, vector<64x128xf32>, vector<16x128xf32> -> vector<16x128xf32>
    %14 = arith.addf %7, %13 : vector<16x128xf32>
    %c1_i32 = arith.constant 1 : i32
    %15 = arith.addi %4, %c1_i32 : i32
    %16 = arith.index_cast %15 : i32 to index
    %c0_7 = arith.constant 0 : index
    %17 = vector.load %arg6[%16, %c0_7] : memref<18x64xf32, #tpu.memory_space<vmem>>, vector<16x64xf32>
    %c1 = arith.constant 1 : index
    %c0_8 = arith.constant 0 : index
    %c0_9 = arith.constant 0 : index
    %18 = vector.load %arg3[%c1, %c0_8, %c0_9] : memref<3x64x128xf32, #tpu.memory_space<vmem>>, vector<1x64x128xf32>
    %19 = vector.shape_cast %18 : vector<1x64x128xf32> to vector<64x128xf32>
    %cst_10 = arith.constant dense<0.000000e+00> : vector<16x128xf32>
    %20 = tpu.matmul %17, %19, %cst_10 {dimension_numbers = #tpu.dot_dimension_numbers<[1], [0], [0], [1], [0, 0, 1, 1], [], []>} : vector<16x64xf32>, vector<64x128xf32>, vector<16x128xf32> -> vector<16x128xf32>
    %21 = arith.addf %14, %20 : vector<16x128xf32>
    %c2_i32 = arith.constant 2 : i32
    %22 = arith.addi %4, %c2_i32 : i32
    %23 = arith.index_cast %22 : i32 to index
    %c0_11 = arith.constant 0 : index
    %24 = vector.load %arg6[%23, %c0_11] : memref<18x64xf32, #tpu.memory_space<vmem>>, vector<16x64xf32>
    %c2 = arith.constant 2 : index
    %c0_12 = arith.constant 0 : index
    %c0_13 = arith.constant 0 : index
    %25 = vector.load %arg3[%c2, %c0_12, %c0_13] : memref<3x64x128xf32, #tpu.memory_space<vmem>>, vector<1x64x128xf32>
    %26 = vector.shape_cast %25 : vector<1x64x128xf32> to vector<64x128xf32>
    %cst_14 = arith.constant dense<0.000000e+00> : vector<16x128xf32>
    %27 = tpu.matmul %24, %26, %cst_14 {dimension_numbers = #tpu.dot_dimension_numbers<[1], [0], [0], [1], [0, 0, 1, 1], [], []>} : vector<16x64xf32>, vector<64x128xf32>, vector<16x128xf32> -> vector<16x128xf32>
    %28 = arith.addf %21, %27 : vector<16x128xf32>
    %c0_15 = arith.constant 0 : index
    %c0_16 = arith.constant 0 : index
    %c0_17 = arith.constant 0 : index
    %29 = vector.load %arg5[%c0_15, %c0_16, %c0_17] : memref<1x16x128xf32, #tpu.memory_space<vmem>>, vector<1x16x128xf32>
    %30 = vector.shape_cast %29 : vector<1x16x128xf32> to vector<16x128xf32>
    %31 = vector.shape_cast %28 : vector<16x128xf32> to vector<1x16x128xf32>
    tpu.vector_store %arg5[%c0_15, %c0_16, %c0_17], %31 {strides = array<i32>} : memref<1x16x128xf32, #tpu.memory_space<vmem>>, vector<1x16x128xf32>,
    return
  }
  func.func @transform_0(%arg0: i32, %arg1: i32) -> (i32, i32, i32) {
    %c0_i32 = arith.constant 0 : i32
    %c0_i32_0 = arith.constant 0 : i32
    %c0_i32_1 = arith.constant 0 : i32
    return %arg0, %c0_i32, %c0_i32_0 : i32, i32, i32
  }
  func.func @transform_1(%arg0: i32, %arg1: i32) -> (i32, i32, i32) {
    %c0_i32 = arith.constant 0 : i32
    %c0_i32_0 = arith.constant 0 : i32
    %c0_i32_1 = arith.constant 0 : i32
    %c0_i32_2 = arith.constant 0 : i32
    return %c0_i32, %c0_i32_0, %c0_i32_1 : i32, i32, i32
  }
  func.func @transform_2(%arg0: i32, %arg1: i32) -> (i32, i32) {
    %c0_i32 = arith.constant 0 : i32
    %c0_i32_0 = arith.constant 0 : i32
    %c0_i32_1 = arith.constant 0 : i32
    return %c0_i32, %c0_i32_0 : i32, i32
  }
  func.func @transform_3(%arg0: i32, %arg1: i32) -> (i32, i32, i32) {
    %c0_i32 = arith.constant 0 : i32
    %c0_i32_0 = arith.constant 0 : i32
    return %arg0, %arg1, %c0_i32 : i32, i32, i32
  }
}

</mosaic_0001>

<bundles_post_ra>
// kernel: tile.8
= control target key start
LH: loop header
LB: loop body
LE: loop exit
PB: predicated region body
PF: predicated region fallthrough
CT: control target
= control target key end

     0   :  { %s28_s0 = inlined_call_operand.vmem [shape: f32[8], index: 0, kind: input, shape index: {}]   ;;  %s29_s1 = inlined_call_operand.vmem [shape: f32[16,8], index: 1, kind: output, shape index: {}]  }
   0x1   :  { %v4_v0 = vld [vmem:[%s28_s0] ss:$0 sm:$0xff] }
   0x2   :  { %5 = vst [vmem:[%s29_s1] sm:$0xff] %v4_v0  ;;  %8 = vst [vmem:[%s29_s1 + $0x8] sm:$0xff] %v4_v0 }

// kernel: tile.9
= control target key start
LH: loop header
LB: loop body
LE: loop exit
PB: predicated region body
PF: predicated region fallthrough
CT: control target
= control target key end

     0   :  { %s133_s10 = smov 120   ;;  %s134_s11 = smov 104   ;;  %vm3_vm0 = vcmask 64512   ;;  %vm9_vm1 = vcmask 1048512   ;;  %vm15_vm2 = vcmask 982912   ;;  %vm21_vm3 = vcmask 917312   ;;  %s209_s0 = inlined_call_operand.vmem [shape: f32[16,8], index: 0, kind: input, shape index: {}]   ;;  %s210_s1 = inlined_call_operand.vmem [shape: f32[1,128], index: 1, kind: output, shape index: {}]  }
   0x1   :  { %v103_v0 = vld [vmem:[%s209_s0 + $0xf] sm:$0x1]   ;;  %v105_v1 = vld [vmem:[%s209_s0 + $0xd] sm:$0x1]   ;;  %v104_v2 = vld [vmem:[%s209_s0 + $0xe] sm:$0x1]  }
   0x2   :  { %7 = vrot.lane.b32.xlu0 %v103_v0, %s133_s10  ;;  %19 = vrot.lane.b32.xlu1 %v105_v1, %s134_s11  ;;  %v106_v3 = vld [vmem:[%s209_s0 + $0xc] sm:$0x1]   ;;  %s135_s16 = smov 112   ;;  %s136_s17 = smov 96   ;;  %v107_v4 = vld [vmem:[%s209_s0 + $0xb] sm:$0x1]  }
   0x3   :  { %v108_v5 = vld [vmem:[%s209_s0 + $0xa] sm:$0x1]   ;;  %v2_v6 = vld [vmem:[%s209_s0] sm:$0x1]   ;;  %s137_s24 = smov 88   ;;  %s138_s25 = smov 80  }
   0x4   :  { %4 = vst.msk [vmem:[#allocation0] sm:$0x1] %vm3_vm0, %v2_v6   ;;  %v109_v7 = vld [vmem:[%s209_s0 + $0x9] sm:$0x1]   ;;  %v110_v8 = vld [vmem:[%s209_s0 + $0x8] sm:$0x1]  }
   0x5   :  { %s139_s30 = smov 72   ;;  %s140_s2 = smov 64   ;;  %v111_v9 = vld [vmem:[%s209_s0 + $0x7] sm:$0x1]   ;;  %v112_v10 = vld [vmem:[%s209_s0 + $0x6] sm:$0x1]  }
   0x6   :  { %13 = vrot.lane.b32.xlu0 %v104_v2, %s135_s16  ;;  %25 = vrot.lane.b32.xlu1 %v106_v3, %s136_s17  ;;  %s141_s7 = smov 56   ;;  %s142_s8 = smov 48   ;;  %v113_v11 = vld [vmem:[%s209_s0 + $0x5] sm:$0x1]   ;;  %v114_v12 = vld [vmem:[%s209_s0 + $0x4] sm:$0x1]  }
   0x7   :  { %s143_s13 = smov 40   ;;  %s144_s14 = smov 32   ;;  %v115_v13 = vld [vmem:[%s209_s0 + $0x3] sm:$0x1]   ;;  %v116_v14 = vld [vmem:[%s209_s0 + $0x2] sm:$0x1]  }
   0x8   :  { %s145_s19 = smov 24   ;;  %s146_s20 = smov 16   ;;  %v117_v15 = vld [vmem:[%s209_s0 + $0x1] sm:$0x1]   ;;  %vm27_vm4 = vcmask 851712   ;;  %vm33_vm5 = vcmask 786112  }
   0x9   :  { %s147_s0 = smov 8   ;;  %vm39_vm6 = vcmask 720512   ;;  %vm45_vm7 = vcmask 654912   ;;  %vm51_vm8 = vcmask 589312   ;;  %vm57_vm9 = vcmask 523712  }
   0xa   :  { %31 = vrot.lane.b32.xlu0 %v107_v4, %s137_s24  ;;  %37 = vrot.lane.b32.xlu1 %v108_v5, %s138_s25  ;;  %vm63_vm10 = vcmask 458112   ;;  %vm69_vm11 = vcmask 392512   ;;  %vm75_vm12 = vcmask 326912   ;;  %vm81_vm13 = vcmask 261312  }
   0xb   :  { %vm87_vm14 = vcmask 195712   ;;  %vm93_vm15 = vcmask 130112  }
   0xe   :  { %43 = vrot.lane.b32.xlu0 %v109_v7, %s139_s30  ;;  %49 = vrot.lane.b32.xlu1 %v110_v8, %s140_s2 }
  0x12   :  { %55 = vrot.lane.b32.xlu0 %v111_v9, %s141_s7  ;;  %61 = vrot.lane.b32.xlu1 %v112_v10, %s142_s8 }
  0x16   :  { %67 = vrot.lane.b32.xlu0 %v113_v11, %s143_s13  ;;  %73 = vrot.lane.b32.xlu1 %v114_v12, %s144_s14 }
  0x1a   :  { %79 = vrot.lane.b32.xlu0 %v115_v13, %s145_s19  ;;  %85 = vrot.lane.b32.xlu1 %v116_v14, %s146_s20 }
  0x1e   :  { %91 = vrot.lane.b32.xlu0 %v117_v15, %s147_s0 }
  0x74   :  { %v8_v16 = vpop.permute.xlu0 %7   ;;  %v20_v17 = vpop.permute.xlu1 %19  }
  0x75   :  { %10 = vst.msk [vmem:[#allocation0] sm:$0x1] %vm9_vm1, %v8_v16  }
  0x78   :  { %v14_v18 = vpop.permute.xlu0 %13   ;;  %v26_v19 = vpop.permute.xlu1 %25  }
  0x79   :  { %16 = vst.msk [vmem:[#allocation0] sm:$0x1] %vm15_vm2, %v14_v18  }
  0x7a   :  { %22 = vst.msk [vmem:[#allocation0] sm:$0x1] %vm21_vm3, %v20_v17  }
  0x7b   :  { %28 = vst.msk [vmem:[#allocation0] sm:$0x1] %vm27_vm4, %v26_v19  }
  0x7c   :  { %v32_v20 = vpop.permute.xlu0 %31   ;;  %v38_v21 = vpop.permute.xlu1 %37  }
  0x7d   :  { %34 = vst.msk [vmem:[#allocation0] sm:$0x1] %vm33_vm5, %v32_v20  }
  0x7e   :  { %40 = vst.msk [vmem:[#allocation0] sm:$0x1] %vm39_vm6, %v38_v21  }
  0x80   :  { %v44_v22 = vpop.permute.xlu0 %43   ;;  %v50_v23 = vpop.permute.xlu1 %49  }
  0x81   :  { %46 = vst.msk [vmem:[#allocation0] sm:$0x1] %vm45_vm7, %v44_v22  }
  0x82   :  { %52 = vst.msk [vmem:[#allocation0] sm:$0x1] %vm51_vm8, %v50_v23  }
  0x84   :  { %v56_v24 = vpop.permute.xlu0 %55   ;;  %v62_v25 = vpop.permute.xlu1 %61  }
  0x85   :  { %58 = vst.msk [vmem:[#allocation0] sm:$0x1] %vm57_vm9, %v56_v24  }
  0x86   :  { %64 = vst.msk [vmem:[#allocation0] sm:$0x1] %vm63_vm10, %v62_v25  }
  0x88   :  { %v68_v26 = vpop.permute.xlu0 %67   ;;  %v74_v27 = vpop.permute.xlu1 %73  }
  0x89   :  { %70 = vst.msk [vmem:[#allocation0] sm:$0x1] %vm69_vm11, %v68_v26  }
  0x8a   :  { %76 = vst.msk [vmem:[#allocation0] sm:$0x1] %vm75_vm12, %v74_v27  }
  0x8c   :  { %v80_v28 = vpop.permute.xlu0 %79   ;;  %v86_v29 = vpop.permute.xlu1 %85  }
  0x8d   :  { %82 = vst.msk [vmem:[#allocation0] sm:$0x1] %vm81_vm13, %v80_v28  }
  0x8e   :  { %88 = vst.msk [vmem:[#allocation0] sm:$0x1] %vm87_vm14, %v86_v29  }
  0x90   :  { %v92_v30 = vpop.permute.xlu0 %91  }
  0x91   :  { %94 = vst.msk [vmem:[#allocation0] sm:$0x1] %vm93_vm15, %v92_v30  }
  0x98   :  { %v99_v31 = vld [vmem:[#allocation0] sm:$0x1] }
  0x99   :  { %102 = vst [vmem:[%s210_s1] sm:$0x1] %v99_v31 }

// kernel: std_conv.1
= control target key start
LH: loop header
LB: loop body
LE: loop exit
PB: predicated region body
PF: predicated region fallthrough
CT: control target
= control target key end

     0   :  { %s792_s12 = smov 0   ;;  %s794_s13 = smov 0   ;;  %s917_s0 = inlined_call_operand.vmem [shape: f32[2,16,64], index: 0, kind: input, shape index: {}]   ;;  %s918_s1 = inlined_call_operand.vmem [shape: f32[3,64,128], index: 1, kind: input, shape index: {}]   ;;  %s919_s2 = inlined_call_operand.vmem [shape: f32[1,128], index: 2, kind: input, shape index: {}]   ;;  %s920_s3 = inlined_call_operand.vmem [shape: f32[2,16,128], index: 3, kind: output, shape index: {}]  }
   0x1   :  { %s796_s14 = smov 0  }
   0x2 LB: > { %s25_s15 = sadd.s32 1, %s765_s13  ;;  %p599_p0 = scmp.ge.s32.totalorder %s769_s14, 1  ;;  %s769_s14 = sphi %s796_s14, %s13_s14   ;;  %s765_s13 = sphi %s794_s13, %s922_s13   ;;  %s761_s12 = sphi %s792_s12, %s921_s12  }
   0x3   : > { %p27_p1 = scmp.ge.s32.totalorder %s25_s15, 2  ;;  %p151_p2 = scmp.lt.s32.totalorder %s769_s14, 3 }
   0x5   : > { %s924_s15 = smov (%p27_p1, %s25_s15), 0  ;;  %p152_p3 = pnand %p599_p0, %p151_p2 }
   0x6   : > { %p179_p4 = scmp.lt.s32.totalorder (!%p152_p3), %s761_s12, 1 }
   0x7   : > { %155 = sbr.rel (%p152_p3) target bundleno = 244 (0xf4), region = 32 }
   0xc   : > { %v227_v0 = vld [vmem:[%s918_s1 + $0x38] sm:$0xff]  ;;  %v226_v1 = vld [vmem:[%s918_s1 + $0x30] sm:$0xff]  ;;  %vm198_vm0 = vcmask 523264   ;;  %v771_v4 = vmov 0.0   ;;  %vm201_vm1 = vcmask 517120   ;;  %v225_v5 = vld [vmem:[%s918_s1 + $0x28] sm:$0xff] }
   0xd   : > { %v616_v2 = vld [vmem:[%s918_s1 + $0x78] sm:$0xff]  ;;  %665 = vmatprep.subr.mxu0 %v227_v0  ;;  %v615_v3 = vld [vmem:[%s918_s1 + $0x70] sm:$0xff]  ;;  %199 = vst.msk [vmem:[#allocation2] sm:$0xff] %vm198_vm0, %v771_v4  ;;  %200 = vst.msk [vmem:[#allocation2 + $0x8] sm:$0xff] %vm198_vm0, %v771_v4  ;;  %s926_s12 = smov (!%p179_p4, %s761_s12), 1 }
   0xe   : > { %684 = vmatprep.subr.mxu1 %v616_v2  ;;  %666 = vmatpush3.msra.mxu0 %v227_v0  ;;  %v614_v6 = vld [vmem:[%s918_s1 + $0x68] sm:$0xff]  ;;  %202 = vst.msk [vmem:[#allocation2 + $0x10] sm:$0x3] %vm201_vm1, %v771_v4  ;;  %v224_v7 = vld [vmem:[%s918_s1 + $0x20] sm:$0xff]  ;;  %s633_s5 = sshll.u32 %s926_s12, 4  ;;  %v223_v9 = vld [vmem:[%s918_s1 + $0x18] sm:$0xff] }
   0xf   : > { %685 = vmatpush3.msra.mxu1 %v616_v2  ;;  %667 = vmatprep.subr.mxu0 %v226_v1  ;;  %v613_v8 = vld [vmem:[%s918_s1 + $0x60] sm:$0xff]  ;;  %s183_s10 = scalar_lea.vmem %s917_s0, %s633_s5  ;;  %v612_v10 = vld [vmem:[%s918_s1 + $0x58] sm:$0xff]  ;;  %v222_v15 = vld [vmem:[%s918_s1 + $0x10] sm:$0xff]  ;;  %s192_s27 = scalar_lea.vmem %s920_s3, %s633_s5 }
  0x10   : > { %686 = vmatprep.subr.mxu1 %v615_v3  ;;  %668 = vmatpush3.msra.mxu0 %v226_v1  ;;  %v203_v11 = vld [vmem:[%s183_s10] sm:$0xff]  ;;  %v204_v12 = vld [vmem:[%s183_s10 + $0x8] sm:$0xff]  ;;  %v611_v16 = vld [vmem:[%s918_s1 + $0x50] sm:$0xff] }
  0x11   : > { %687 = vmatpush3.msra.mxu1 %v615_v3  ;;  %669 = vmatprep.subr.mxu0 %v225_v5  ;;  %v205_v13 = vmax.f32 %v203_v11, 0.0  ;;  %v206_v14 = vmax.f32 %v204_v12, 0.0  ;;  %v221_v17 = vld [vmem:[%s918_s1 + $0x8] sm:$0xff]  ;;  %v220_v19 = vld [vmem:[%s918_s1] sm:$0xff]  ;;  %v628_v21 = vld [vmem:[%s918_s1 + $0xb8] sm:$0xff] }
  0x12   : > { %688 = vmatprep.subr.mxu1 %v614_v6  ;;  %670 = vmatpush3.msra.mxu0 %v225_v5  ;;  %v610_v18 = vld [vmem:[%s918_s1 + $0x48] sm:$0xff]  ;;  %v609_v20 = vld [vmem:[%s918_s1 + $0x40] sm:$0xff]  ;;  %v627_v25 = vld [vmem:[%s918_s1 + $0xb0] sm:$0xff] }
  0x13   : > { %689 = vmatpush3.msra.mxu1 %v614_v6  ;;  %671 = vmatprep.subr.mxu0 %v224_v7  ;;  %207 = vst.msk [vmem:[#allocation2 + $0x1] sm:$0xff] %vm198_vm0, %v205_v13  ;;  %208 = vst.msk [vmem:[#allocation2 + $0x9] sm:$0xff] %vm198_vm0, %v206_v14  ;;  %v626_v28 = vld [vmem:[%s918_s1 + $0xa8] sm:$0xff]  ;;  %v625_v29 = vld [vmem:[%s918_s1 + $0xa0] sm:$0xff] }
  0x14   : > { %690 = vmatprep.subr.mxu1 %v613_v8  ;;  %672 = vmatpush3.msra.mxu0 %v224_v7  ;;  %v624_v30 = vld [vmem:[%s918_s1 + $0x98] sm:$0xff]  ;;  %v623_v31 = vld [vmem:[%s918_s1 + $0x90] sm:$0xff]  ;;  %v622_v32 = vld [vmem:[%s918_s1 + $0x88] sm:$0xff] }
  0x15   : > { %691 = vmatpush3.msra.mxu1 %v613_v8  ;;  %673 = vmatprep.subr.mxu0 %v223_v9  ;;  %v621_v33 = vld [vmem:[%s918_s1 + $0x80] sm:$0xff] }
  0x16   : > { %692 = vmatprep.subr.mxu1 %v612_v10  ;;  %674 = vmatpush3.msra.mxu0 %v223_v9  ;;  %v604_v36 = vld [vmem:[%s919_s2] ss:$0 sm:$0xff] }
  0x17   : > { %693 = vmatpush3.msra.mxu1 %v612_v10  ;;  %675 = vmatprep.subr.mxu0 %v222_v15 }
  0x18   : > { %694 = vmatprep.subr.mxu1 %v611_v16  ;;  %676 = vmatpush3.msra.mxu0 %v222_v15 }
  0x19   : > { %695 = vmatpush3.msra.mxu1 %v611_v16  ;;  %677 = vmatprep.subr.mxu0 %v221_v17 }
  0x1a   : > { %696 = vmatprep.subr.mxu1 %v610_v18  ;;  %678 = vmatpush3.msra.mxu0 %v221_v17  ;;  %v218_v22 = vld [vmem:[#allocation2] sm:$0xff]  ;;  %v219_v23 = vld [vmem:[#allocation2 + $0x8] sm:$0xff] }
  0x1b   : > { %697 = vmatpush3.msra.mxu1 %v610_v18  ;;  %679 = vmatprep.subr.mxu0 %v220_v19  ;;  %v607_v24 = vld [vmem:[#allocation2 + $0x1] sm:$0xff]  ;;  %v608_v26 = vld [vmem:[#allocation2 + $0x9] sm:$0xff] }
  0x1c   : > { %698 = vmatprep.subr.mxu1 %v609_v20  ;;  %680 = vmatpush3.msra.mxu0 %v220_v19  ;;  %v619_v27 = vld [vmem:[#allocation2 + $0x2] sm:$0xff]  ;;  %v620_v34 = vld [vmem:[#allocation2 + $0xa] sm:$0xff] }
  0x1d   : > { %699 = vmatpush3.msra.mxu1 %v609_v20  ;;  %681 = vmatprep.mubr.msk.f32.mxu0 %vm198_vm0, %v218_v22 }
  0x1e   : > { %703 = vmatprep.subr.mxu0 %v628_v21  ;;  %682 = vmatmul.mubr.msk.f32.vlgmr.msra.gmra.mxu0 %vm198_vm0, %v219_v23 }
  0x1f   : > { %700 = vmatprep.mubr.msk.f32.mxu1 %vm198_vm0, %v607_v24  ;;  %704 = vmatpush3.msra.mxu0 %v628_v21 }
  0x20   : > { %701 = vmatmul.mubr.msk.f32.vlgmr.msra.gmra.mxu1 %vm198_vm0, %v608_v26  ;;  %705 = vmatprep.subr.mxu0 %v627_v25 }
  0x21   : > { %719 = vmatprep.mubr.msk.f32.mxu0 %vm198_vm0, %v619_v27  ;;  %706 = vmatpush3.msra.mxu0 %v627_v25 }
  0x22   : > { %707 = vmatprep.subr.mxu0 %v626_v28 }
  0x23   : > { %708 = vmatpush3.msra.mxu0 %v626_v28 }
  0x24   : > { %709 = vmatprep.subr.mxu0 %v625_v29 }
  0x25   : > { %710 = vmatpush3.msra.mxu0 %v625_v29 }
  0x26   : > { %711 = vmatprep.subr.mxu0 %v624_v30 }
  0x27   : > { %712 = vmatpush3.msra.mxu0 %v624_v30 }
  0x28   : > { %713 = vmatprep.subr.mxu0 %v623_v31 }
  0x29   : > { %714 = vmatpush3.msra.mxu0 %v623_v31 }
  0x2a   : > { %715 = vmatprep.subr.mxu0 %v622_v32 }
  0x2b   : > { %716 = vmatpush3.msra.mxu0 %v622_v32 }
  0x2c   : > { %717 = vmatprep.subr.mxu0 %v621_v33 }
  0x2d   : > { %718 = vmatpush3.msra.mxu0 %v621_v33 }
  0x2e   : > { %720 = vmatmul.mubr.msk.f32.vlgmr.msra.gmra.mxu0 %vm198_vm0, %v620_v34 }
  0xde   : > { %v683_v35 = vpop.f32.mrf.mxu0 }
  0xdf   : > { %v311_v39 = vadd.f32 %v683_v35, %v604_v36 }
  0xe0   : > { %v301_v37 = vpop.f32.mrf.mxu0  ;;  %v702_v38 = vpop.f32.mrf.mxu1 }
  0xe1   : > { %v310_v40 = vadd.f32 %v604_v36, %v301_v37  ;;  %v407_v42 = vadd.f32 %v702_v38, %v311_v39 }
  0xe2   : > { %v397_v41 = vpop.f32.mrf.mxu1 }
  0xe3   : > { %v406_v44 = vadd.f32 %v397_v41, %v310_v40 }
  0xee   : > { %v721_v43 = vpop.f32.mrf.mxu0 }
  0xef   : > { %v503_v45 = vadd.f32 %v721_v43, %v407_v42 }
  0xf0   : > { %v493_v46 = vpop.f32.mrf.mxu0 }
  0xf1   : > { %505 = vst [vmem:[%s192_s27 + $0x8] sm:$0xff] %v503_v45  ;;  %v502_v47 = vadd.f32 %v493_v46, %v406_v44 }
  0xf3   : > { %504 = vst [vmem:[%s192_s27] sm:$0xff] %v502_v47 }
  0xf4 PF: > { %s13_s14 = sadd.s32 1, %s769_s14   ;;  %s921_s12 = smov %s765_s13 }
  0xf5   : > { %p10_p5 = scmp.ge.s32.totalorder %s13_s14, 4   ;;  %s922_s13 = smov %s924_s15 }
  0xf7   :  { %12 = sbr.rel (!%p10_p5) target bundleno = 2 (0x2), region = 71 }

</bundles_post_ra>
